<compile_context>
chip_gen: v7x
topology: tpu7x:2x2x1
jax: 0.10.0
libtpu: 0.0.40
codegen_flags: <defaults>
</compile_context>

<pallas_src>
import functools

import jax
import jax.numpy as jnp
from jax import lax
from jax.experimental import pallas as pl
from jax.experimental.pallas import tpu as pltpu


def _round_up(x, m):
    return ((x + m - 1) // m) * m


def _make_clf_head_kernel(num_layers):
    """Kernel over one row-tile of the batch; full (padded) weights in VMEM."""

    def kernel(*refs):
        h_ref = refs[0]
        out_ref = refs[-1]
        wb_refs = refs[1:-1]

        x = h_ref[...]  # bf16 activations, fed straight to the MXU
        for l in range(num_layers):
            w_ref = wb_refs[2 * l]
            b_ref = wb_refs[2 * l + 1]
            # MXU: bf16 x bf16 -> f32 accumulate; bias added in f32 epilogue (VPU).
            y = jnp.dot(x, w_ref[...], preferred_element_type=jnp.float32)
            y = y + b_ref[...]
            if l < num_layers - 1:
                # hidden layer: ReLU, back to bf16 for the next MXU pass
                x = jnp.maximum(y, 0.0).astype(jnp.bfloat16)
            else:
                x = y
        out_ref[...] = x.astype(out_ref.dtype)

    return kernel


def clf_head_forward(h, params, *, row_tile=256, lane=128):
    """h: (N, n_embd) f32/bf16; params: list of (W(in,out), b(1,out)).
    Returns (N, n_class) f32 logits. Eval semantics (dropout = identity)."""
    assert row_tile % 8 == 0
    N, n_in0 = h.shape
    num_layers = len(params)
    n_class = params[-1][0].shape[1]

    # Clamp the row tile for small batches (still a multiple of 8).
    row_tile = min(row_tile, _round_up(max(N, 1), 8))

    # ---- pad batch to row_tile and ALL feature dims to lane-dense 128 mults ----
    n_pad = _round_up(max(N, 1), row_tile)
    n_in0_pad = _round_up(n_in0, lane)
    h_p = jnp.zeros((n_pad, n_in0_pad), jnp.bfloat16).at[:N, :n_in0].set(
        h.astype(jnp.bfloat16))

    padded = []
    prev_out_pad = n_in0_pad
    for (w, b) in params:
        n_in, n_out = w.shape
        n_out_pad = _round_up(n_out, lane)
        w_p = jnp.zeros((prev_out_pad, n_out_pad), jnp.bfloat16)
        w_p = w_p.at[:n_in, :n_out].set(w.astype(jnp.bfloat16))
        b_p = jnp.zeros((1, n_out_pad), jnp.float32)
        b_p = b_p.at[:, :n_out].set(b.astype(jnp.float32))
        padded.append((w_p, b_p))
        prev_out_pad = n_out_pad
    n_class_pad = padded[-1][0].shape[1]

    # ---- grid / specs ----
    grid = (n_pad // row_tile,)
    in_specs = [pl.BlockSpec((row_tile, n_in0_pad), lambda i: (i, 0))]
    flat_inputs = [h_p]
    for (w_p, b_p) in padded:
        # Weights/biases are grid-invariant (index_map always (0,0)); Pallas
        # loads them once and reuses across the parallel row-tile steps.
        # TODO(synk): K-tile the first matmul + pl.Buffered(1) weight blocks for
        # production embed sizes on v7x's 64 MiB VMEM; unnecessary at demo shapes.
        in_specs.append(pl.BlockSpec(w_p.shape, lambda i: (0, 0)))
        in_specs.append(pl.BlockSpec(b_p.shape, lambda i: (0, 0)))
        flat_inputs += [w_p, b_p]
    out_specs = pl.BlockSpec((row_tile, n_class_pad), lambda i: (i, 0))

    # ---- advisory cost estimate for the XLA scheduler ----
    flops = 2 * n_pad * sum(w.shape[0] * w.shape[1] for w, _ in padded)
    bytes_accessed = (h_p.size * 2
                      + sum(w.size * 2 + b.size * 4 for w, b in padded)
                      + n_pad * n_class_pad * 4)
    cost = pl.CostEstimate(flops=flops, transcendentals=0,
                           bytes_accessed=bytes_accessed)

    out = pl.pallas_call(
        _make_clf_head_kernel(num_layers),
        out_shape=jax.ShapeDtypeStruct((n_pad, n_class_pad), jnp.float32),
        grid_spec=pltpu.PrefetchScalarGridSpec(
            num_scalar_prefetch=0,
            grid=grid,
            in_specs=in_specs,
            out_specs=out_specs,
        ),
        compiler_params=pltpu.CompilerParams(
            dimension_semantics=("parallel",),
        ),
        cost_estimate=cost,
    )(*flat_inputs)

    # Slice away batch padding and lane padding of the class dimension.
    return out[:N, :n_class]


def make_params(key, n_embd, clf_hs, n_class):
    """Matches the PyTorch init: weight ~ N(0, 0.02), bias ~ N(0, 1)
    (nn.init.normal_(bias, 0) sets mean=0, std stays default 1).
    Weights stored pre-transposed as (in_features, out_features)."""
    n_hs = [n_embd] + list(clf_hs) + [n_class]
    params = []
    for i in range(len(n_hs) - 1):
        key, kw, kb = jax.random.split(key, 3)
        w = 0.02 * jax.random.normal(kw, (n_hs[i], n_hs[i + 1]), jnp.float32)
        b = jax.random.normal(kb, (1, n_hs[i + 1]), jnp.float32)
        params.append((w, b))
    return params


def reference_forward(h, params):
    """Pure-JAX reference mirroring the kernel's dtype path
    (bf16 operands, f32 accumulate), eval-mode dropout == identity."""
    x = h.astype(jnp.bfloat16)
    for i, (w, b) in enumerate(params):
        y = jnp.dot(x.astype(jnp.float32),
                    w.astype(jnp.bfloat16).astype(jnp.float32),
                    precision=lax.Precision.HIGHEST) + b
        if i < len(params) - 1:
            x = jnp.maximum(y, 0.0).astype(jnp.bfloat16)
        else:
            x = y
    return x


if __name__ == "__main__":
    key = jax.random.PRNGKey(0)
    k_h, k_p = jax.random.split(key)

    # Small config consistent with ClfHead: n_embd=128, clf_hs=[256], n_class=4.
    # N=512 with row_tile=256 -> grid of 2 parallel steps (keeps both v7x TCs busy).
    N, n_embd, clf_hs, n_class = 512, 128, [256], 4
    h = jax.random.normal(k_h, (N, n_embd), jnp.float32)
    params = make_params(k_p, n_embd, clf_hs, n_class)

    fwd = jax.jit(functools.partial(clf_head_forward, row_tile=256))
    logits = fwd(h, params)
    logits = jax.block_until_ready(logits)

    ref = reference_forward(h, params)
    assert logits.shape == (N, n_class)
    max_err = float(jnp.max(jnp.abs(logits - ref)))
    assert jnp.allclose(logits, ref, atol=1e-2, rtol=1e-2), (
        f"mismatch vs reference (max abs err {max_err})")

    # TODO(synk): dropout omitted (inference semantics); training-mode dropout
    # would use pltpu.prng_seed + pltpu.prng_random_bits inside the kernel.
    print("KERNEL_OK")
</pallas_src>

<mosaic_0001>
module attributes {stable_mosaic.version = 11 : i64} {
  func.func @kernel(%arg0: i32, %arg1: memref<256x128xbf16, #tpu.memory_space<vmem>>, %arg2: memref<128x256xbf16, #tpu.memory_space<vmem>>, %arg3: memref<1x256xf32, #tpu.memory_space<vmem>>, %arg4: memref<256x128xbf16, #tpu.memory_space<vmem>>, %arg5: memref<1x128xf32, #tpu.memory_space<vmem>>, %arg6: memref<256x128xf32, #tpu.memory_space<vmem>>) attributes {dimension_semantics = [#tpu.dimension_semantics<parallel>], iteration_bounds = array<i64: 2>, scalar_prefetch = 0 : i64, scratch_operands = 0 : i64, tpu.core_type = #tpu.core_type<tc>, window_params = [{transform_indices = @transform_0, window_bounds = array<i64: 256, 128>}, {pipeline_mode = #tpu.pipeline_mode<synchronous>, transform_indices = @transform_1, window_bounds = array<i64: 128, 256>}, {pipeline_mode = #tpu.pipeline_mode<synchronous>, transform_indices = @transform_2, window_bounds = array<i64: 1, 256>}, {pipeline_mode = #tpu.pipeline_mode<synchronous>, transform_indices = @transform_3, window_bounds = array<i64: 256, 128>}, {pipeline_mode = #tpu.pipeline_mode<synchronous>, transform_indices = @transform_4, window_bounds = array<i64: 1, 128>}, {transform_indices = @transform_5, window_bounds = array<i64: 256, 128>}]} {
    %c0 = arith.constant 0 : index
    %c0_0 = arith.constant 0 : index
    %0 = vector.load %arg1[%c0, %c0_0] : memref<256x128xbf16, #tpu.memory_space<vmem>>, vector<256x128xbf16>
    %c0_1 = arith.constant 0 : index
    %c0_2 = arith.constant 0 : index
    %1 = vector.load %arg2[%c0_1, %c0_2] : memref<128x256xbf16, #tpu.memory_space<vmem>>, vector<128x256xbf16>
    %cst = arith.constant dense<0.000000e+00> : vector<256x256xf32>
    %2 = tpu.matmul %0, %1, %cst {dimension_numbers = #tpu.dot_dimension_numbers<[1], [0], [0], [1], [0, 0, 1, 1], [], []>} : vector<256x128xbf16>, vector<128x256xbf16>, vector<256x256xf32> -> vector<256x256xf32>
    %c0_3 = arith.constant 0 : index
    %c0_4 = arith.constant 0 : index
    %3 = vector.load %arg3[%c0_3, %c0_4] : memref<1x256xf32, #tpu.memory_space<vmem>>, vector<1x256xf32>
    %4 = vector.broadcast %3 : vector<1x256xf32> to vector<256x256xf32>
    %5 = arith.addf %2, %4 : vector<256x256xf32>
    %cst_5 = arith.constant 0.000000e+00 : f32
    %6 = vector.broadcast %cst_5 : f32 to vector<256x256xf32>
    %7 = arith.maximumf %5, %6 : vector<256x256xf32>
    %8 = arith.truncf %7 : vector<256x256xf32> to vector<256x256xbf16>
    %c0_6 = arith.constant 0 : index
    %c0_7 = arith.constant 0 : index
    %9 = vector.load %arg4[%c0_6, %c0_7] : memref<256x128xbf16, #tpu.memory_space<vmem>>, vector<256x128xbf16>
    %cst_8 = arith.constant dense<0.000000e+00> : vector<256x128xf32>
    %10 = tpu.matmul %8, %9, %cst_8 {dimension_numbers = #tpu.dot_dimension_numbers<[1], [0], [0], [1], [0, 0, 1, 1], [], []>} : vector<256x256xbf16>, vector<256x128xbf16>, vector<256x128xf32> -> vector<256x128xf32>
    %c0_9 = arith.constant 0 : index
    %c0_10 = arith.constant 0 : index
    %11 = vector.load %arg5[%c0_9, %c0_10] : memref<1x128xf32, #tpu.memory_space<vmem>>, vector<1x128xf32>
    %12 = vector.broadcast %11 : vector<1x128xf32> to vector<256x128xf32>
    %13 = arith.addf %10, %12 : vector<256x128xf32>
    %c0_11 = arith.constant 0 : index
    %c0_12 = arith.constant 0 : index
    %14 = vector.load %arg6[%c0_11, %c0_12] : memref<256x128xf32, #tpu.memory_space<vmem>>, vector<256x128xf32>
    tpu.vector_store %arg6[%c0_11, %c0_12], %13 {strides = array<i32>} : memref<256x128xf32, #tpu.memory_space<vmem>>, vector<256x128xf32>,
    return
  }
  func.func @transform_0(%arg0: i32) -> (i32, i32) {
    %c0_i32 = arith.constant 0 : i32
    %c0_i32_0 = arith.constant 0 : i32
    return %arg0, %c0_i32 : i32, i32
  }
  func.func @transform_1(%arg0: i32) -> (i32, i32) {
    %c0_i32 = arith.constant 0 : i32
    %c0_i32_0 = arith.constant 0 : i32
    %c0_i32_1 = arith.constant 0 : i32
    return %c0_i32, %c0_i32_0 : i32, i32
  }
  func.func @transform_2(%arg0: i32) -> (i32, i32) {
    %c0_i32 = arith.constant 0 : i32
    %c0_i32_0 = arith.constant 0 : i32
    %c0_i32_1 = arith.constant 0 : i32
    return %c0_i32, %c0_i32_0 : i32, i32
  }
  func.func @transform_3(%arg0: i32) -> (i32, i32) {
    %c0_i32 = arith.constant 0 : i32
    %c0_i32_0 = arith.constant 0 : i32
    %c0_i32_1 = arith.constant 0 : i32
    return %c0_i32, %c0_i32_0 : i32, i32
  }
  func.func @transform_4(%arg0: i32) -> (i32, i32) {
    %c0_i32 = arith.constant 0 : i32
    %c0_i32_0 = arith.constant 0 : i32
    %c0_i32_1 = arith.constant 0 : i32
    return %c0_i32, %c0_i32_0 : i32, i32
  }
  func.func @transform_5(%arg0: i32) -> (i32, i32) {
    %c0_i32 = arith.constant 0 : i32
    %c0_i32_0 = arith.constant 0 : i32
    return %arg0, %c0_i32 : i32, i32
  }
}

</mosaic_0001>

<bundles_post_ra>
// kernel: clf_head_forward.1
= control target key start
LH: loop header
LB: loop body
LE: loop exit
PB: predicated region body
PF: predicated region fallthrough
CT: control target
= control target key end

     0   :  { %s1414_s18 = smov 0   ;;  %s1707_s0 = inlined_call_operand.vmem [shape: bf16[512,128], index: 0, kind: input, shape index: {}]   ;;  %s1708_s1 = inlined_call_operand.vmem [shape: bf16[128,256], index: 1, kind: input, shape index: {}]   ;;  %s1709_s2 = inlined_call_operand.vmem [shape: f32[1,256], index: 2, kind: input, shape index: {}]   ;;  %s1710_s3 = inlined_call_operand.vmem [shape: bf16[256,128], index: 3, kind: input, shape index: {}]   ;;  %s1711_s4 = inlined_call_operand.vmem [shape: f32[1,128], index: 4, kind: input, shape index: {}]   ;;  %s1712_s5 = inlined_call_operand.vmem [shape: f32[512,128], index: 5, kind: output, shape index: {}]  }
   0x1 LB: > { %s1138_s19 = sadd.s32 4294967295, %s1381_s18   ;;  %p1142_p0 = scmp.ge.s32.totalorder %s1381_s18, 1  ;;  %s1381_s18 = sphi %s1414_s18, %s15_s18  }
   0x2   : > { %p188_p1 = scmp.lt.s32.totalorder %s1381_s18, 3 }
   0x4   : > { %p189_p2 = pnand %p1142_p0, %p188_p1 }
   0x5   : > { %v1319_v0 = vld [vmem:[%s1708_s1 + $0x4] ss:$8 sps:$4 sm:$0xff] (!%p189_p2)   ;;  %s1143_s22 = sshll.u32 (!%p189_p2), %s1138_s19, 5  ;;  %v1321_v1 = vld [vmem:[%s1708_s1] ss:$8 sps:$4 sm:$0xff] (!%p189_p2)   ;;  %v1383_v2 = vmov (!%p189_p2), 0   ;;  %v279_v49 = vlaneseq (!%p189_p2) }
   0x6   : > { %192 = sbr.rel (%p189_p2) target bundleno = 600 (0x258), region = 40  ;;  %497 = vmatprep.mubr.bf16.mxu0 (!%p189_p2), %v1383_v2  ;;  %p217_p3 = scmp.lt.s32.totalorder (!%p189_p2), %s1143_s22, 63  ;;  %465 = vmatprep.subr.bf16.mxu0 (!%p189_p2), %v1319_v0  ;;  %v1322_v3 = vld [vmem:[%s1708_s1 + $0x14] ss:$8 sps:$4 sm:$0xff] (!%p189_p2)   ;;  %v1324_v4 = vld [vmem:[%s1708_s1 + $0x10] ss:$8 sps:$4 sm:$0xff] (!%p189_p2)  }
   0x7   : > { %466 = vmatpush1.bf16.msra.mxu0 (!%p189_p2), %v1321_v1  ;;  %v1325_v5 = vld [vmem:[%s1708_s1 + $0x24] ss:$8 sps:$4 sm:$0xff] (!%p189_p2)   ;;  %v1327_v6 = vld [vmem:[%s1708_s1 + $0x20] ss:$8 sps:$4 sm:$0xff] (!%p189_p2)   ;;  %v1328_v7 = vld [vmem:[%s1708_s1 + $0x34] ss:$8 sps:$4 sm:$0xff] (!%p189_p2)  }
   0x8   : > { %467 = vmatprep.subr.bf16.mxu0 (!%p189_p2), %v1322_v3  ;;  %v1330_v8 = vld [vmem:[%s1708_s1 + $0x30] ss:$8 sps:$4 sm:$0xff] (!%p189_p2)   ;;  %v1331_v9 = vld [vmem:[%s1708_s1 + $0x44] ss:$8 sps:$4 sm:$0xff] (!%p189_p2)   ;;  %v1333_v10 = vld [vmem:[%s1708_s1 + $0x40] ss:$8 sps:$4 sm:$0xff] (!%p189_p2)  }
   0x9   : > { %v1334_v11 = vld [vmem:[%s1708_s1 + $0x54] ss:$8 sps:$4 sm:$0xff] (!%p189_p2)   ;;  %v1336_v12 = vld [vmem:[%s1708_s1 + $0x50] ss:$8 sps:$4 sm:$0xff] (!%p189_p2)   ;;  %v1337_v13 = vld [vmem:[%s1708_s1 + $0x64] ss:$8 sps:$4 sm:$0xff] (!%p189_p2)  }
   0xa   : > { %v1339_v14 = vld [vmem:[%s1708_s1 + $0x60] ss:$8 sps:$4 sm:$0xff] (!%p189_p2)   ;;  %v1340_v15 = vld [vmem:[%s1708_s1 + $0x74] ss:$8 sps:$4 sm:$0xff] (!%p189_p2)   ;;  %v1342_v16 = vld [vmem:[%s1708_s1 + $0x70] ss:$8 sps:$4 sm:$0xff] (!%p189_p2)  }
   0xb   : > { %468 = vmatpush1.bf16.msra.mxu0 (!%p189_p2), %v1324_v4  ;;  %v1359_v17 = vld [vmem:[%s1710_s3 + $0x40] sm:$0xff] (!%p189_p2)   ;;  %v1361_v20 = vld [vmem:[%s1710_s3 + $0x48] sm:$0xff] (!%p189_p2)   ;;  %v1363_v22 = vld [vmem:[%s1710_s3 + $0x50] sm:$0xff] (!%p189_p2)   ;;  %v280_v50 = vshrl.u32 (!%p189_p2), %v279_v49, 7 }
   0xc   : > { %469 = vmatprep.subr.bf16.mxu0 (!%p189_p2), %v1325_v5  ;;  %v1360_v19 = vld [vmem:[%s1710_s3] sm:$0xff] (!%p189_p2)   ;;  %1198 = vmatprep.subr.bf16.mxu1 (!%p189_p2), %v1359_v17  ;;  %v1362_v21 = vld [vmem:[%s1710_s3 + $0x8] sm:$0xff] (!%p189_p2)   ;;  %v1364_v23 = vld [vmem:[%s1710_s3 + $0x10] sm:$0xff] (!%p189_p2)  }
   0xd   : > { %s1714_s22 = smov (!%p217_p3, %s1143_s22), 63  ;;  %1199 = vmatpush3.bf16.msra.mxu1 %v1360_v19  ;;  %v1365_v24 = vld [vmem:[%s1710_s3 + $0x58] sm:$0xff]   ;;  %v1367_v27 = vld [vmem:[%s1710_s3 + $0x60] sm:$0xff]   ;;  %v1369_v29 = vld [vmem:[%s1710_s3 + $0x68] sm:$0xff]   ;;  %v281_v51 = vsub.s32 0, %v280_v50  ;;  %v285_v53 = vsub.s32 1, %v280_v50 }
   0xe   : > { %s1144_s6 = sshll.u32 %s1714_s22, 2  ;;  %1200 = vmatprep.subr.bf16.mxu1 %v1361_v20  ;;  %v1366_v26 = vld [vmem:[%s1710_s3 + $0x18] sm:$0xff]   ;;  %v1368_v28 = vld [vmem:[%s1710_s3 + $0x20] sm:$0xff]   ;;  %v1370_v39 = vld [vmem:[%s1710_s3 + $0x28] sm:$0xff]  }
   0xf   : > { %s1450_s13 = scalar_lea.vmem %s1707_s0, %s1144_s6  ;;  %470 = vmatpush1.bf16.msra.mxu0 %v1327_v6  ;;  %v1371_v41 = vld [vmem:[%s1710_s3 + $0x70] sm:$0xff]   ;;  %v1373_v43 = vld [vmem:[%s1710_s3 + $0x78] sm:$0xff]   ;;  %v277_v52 = vld [vmem:[%s1709_s2] sm:$0x3] }
  0x10   : > { %471 = vmatprep.subr.bf16.mxu0 %v1328_v7  ;;  %v1343_v18 = vld [vmem:[%s1450_s13] sm:$0xff]   ;;  %v1344_v25 = vld [vmem:[%s1450_s13 + $0x8] sm:$0xff]   ;;  %v1345_v30 = vld [vmem:[%s1450_s13 + $0x10] sm:$0xff]   ;;  %v1561_v54 = vrot.slane %v277_v52, %v281_v51  ;;  %v1563_v55 = vrot.slane %v277_v52, %v285_v53 }
  0x11   : > { %1201 = vmatpush3.bf16.msra.mxu1 %v1362_v21  ;;  %v1346_v31 = vld [vmem:[%s1450_s13 + $0x18] sm:$0xff]   ;;  %v1347_v32 = vld [vmem:[%s1450_s13 + $0x20] sm:$0xff]   ;;  %v1348_v33 = vld [vmem:[%s1450_s13 + $0x28] sm:$0xff]  }
  0x12   : > { %1202 = vmatprep.subr.bf16.mxu1 %v1363_v22  ;;  %v1349_v34 = vld [vmem:[%s1450_s13 + $0x30] sm:$0xff]   ;;  %v1350_v35 = vld [vmem:[%s1450_s13 + $0x38] sm:$0xff]   ;;  %v1351_v36 = vld [vmem:[%s1450_s13 + $0x40] sm:$0xff]  }
  0x13   : > { %472 = vmatpush1.bf16.msra.mxu0 %v1330_v8  ;;  %v1352_v37 = vld [vmem:[%s1450_s13 + $0x48] sm:$0xff]   ;;  %v1353_v38 = vld [vmem:[%s1450_s13 + $0x50] sm:$0xff]   ;;  %v1354_v40 = vld [vmem:[%s1450_s13 + $0x58] sm:$0xff]  }
  0x14   : > { %473 = vmatprep.subr.bf16.mxu0 %v1331_v9  ;;  %v1372_v42 = vld [vmem:[%s1710_s3 + $0x30] sm:$0xff]   ;;  %v1374_v44 = vld [vmem:[%s1710_s3 + $0x38] sm:$0xff]   ;;  %v1355_v45 = vld [vmem:[%s1450_s13 + $0x60] sm:$0xff]  }
  0x15   : > { %1203 = vmatpush3.bf16.msra.mxu1 %v1364_v23  ;;  %v1356_v46 = vld [vmem:[%s1450_s13 + $0x68] sm:$0xff]   ;;  %v1357_v47 = vld [vmem:[%s1450_s13 + $0x70] sm:$0xff]   ;;  %v1358_v48 = vld [vmem:[%s1450_s13 + $0x78] sm:$0xff]   ;;  %s1146_s13 = sshll.u32 %s1714_s22, 3 }
  0x16   : > { %1204 = vmatprep.subr.bf16.mxu1 %v1365_v24  ;;  %s1638_s28 = scalar_lea.vmem %s1712_s5, %s1146_s13 }
  0x17   : > { %474 = vmatpush1.bf16.msra.mxu0 %v1333_v10 }
  0x18   : > { %475 = vmatprep.subr.bf16.mxu0 %v1334_v11 }
  0x19   : > { %1205 = vmatpush3.bf16.msra.mxu1 %v1366_v26 }
  0x1a   : > { %1206 = vmatprep.subr.bf16.mxu1 %v1367_v27 }
  0x1b   : > { %476 = vmatpush1.bf16.msra.mxu0 %v1336_v12 }
  0x1c   : > { %477 = vmatprep.subr.bf16.mxu0 %v1337_v13 }
  0x1d   : > { %1207 = vmatpush3.bf16.msra.mxu1 %v1368_v28 }
  0x1e   : > { %1208 = vmatprep.subr.bf16.mxu1 %v1369_v29 }
  0x1f   : > { %478 = vmatpush1.bf16.msra.mxu0 %v1339_v14 }
  0x20   : > { %479 = vmatprep.subr.bf16.mxu0 %v1340_v15 }
  0x21   : > { %1209 = vmatpush3.bf16.msra.mxu1 %v1370_v39 }
  0x22   : > { %1210 = vmatprep.subr.bf16.mxu1 %v1371_v41 }
  0x23   : > { %480 = vmatpush1.bf16.msra.mxu0 %v1342_v16 }
  0x25   : > { %1211 = vmatpush3.bf16.msra.mxu1 %v1372_v42 }
  0x26   : > { %498 = vmatmul.mubr.bf16.vlgmr.msra.gmra.mrb[0].mxu0 %v1343_v18  ;;  %1212 = vmatprep.subr.bf16.mxu1 %v1373_v43 }
  0x27   : > { %507 = vmatprep.mubr.bf16.mxu0 %v1383_v2 }
  0x29   : > { %1213 = vmatpush3.bf16.msra.mxu1 %v1374_v44 }
  0x2e   : > { %508 = vmatmul.mubr.bf16.gmra.mrb[4].mxu0 %v1344_v25 }
  0x2f   : > { %517 = vmatprep.mubr.bf16.mxu0 %v1383_v2 }
  0x36   : > { %518 = vmatmul.mubr.bf16.gmra.mrb[8].mxu0 %v1345_v30 }
  0x37   : > { %527 = vmatprep.mubr.bf16.mxu0 %v1383_v2 }
  0x3e   : > { %528 = vmatmul.mubr.bf16.gmra.mrb[12].mxu0 %v1346_v31 }
  0x3f   : > { %537 = vmatprep.mubr.bf16.mxu0 %v1383_v2 }
  0x46   : > { %538 = vmatmul.mubr.bf16.gmra.mrb[16].mxu0 %v1347_v32 }
  0x47   : > { %547 = vmatprep.mubr.bf16.mxu0 %v1383_v2 }
  0x4e   : > { %548 = vmatmul.mubr.bf16.gmra.mrb[20].mxu0 %v1348_v33 }
  0x4f   : > { %557 = vmatprep.mubr.bf16.mxu0 %v1383_v2 }
  0x56   : > { %558 = vmatmul.mubr.bf16.gmra.mrb[24].mxu0 %v1349_v34 }
  0x57   : > { %567 = vmatprep.mubr.bf16.mxu0 %v1383_v2 }
  0x5e   : > { %568 = vmatmul.mubr.bf16.gmra.mrb[28].mxu0 %v1350_v35 }
  0x5f   : > { %577 = vmatprep.mubr.bf16.mxu0 %v1383_v2 }
  0x66   : > { %578 = vmatmul.mubr.bf16.gmra.mrb[32].mxu0 %v1351_v36 }
  0x67   : > { %587 = vmatprep.mubr.bf16.mxu0 %v1383_v2 }
  0x6e   : > { %588 = vmatmul.mubr.bf16.gmra.mrb[36].mxu0 %v1352_v37 }
  0x6f   : > { %597 = vmatprep.mubr.bf16.mxu0 %v1383_v2 }
  0x76   : > { %598 = vmatmul.mubr.bf16.gmra.mrb[40].mxu0 %v1353_v38 }
  0x77   : > { %607 = vmatprep.mubr.bf16.mxu0 %v1383_v2 }
  0x7e   : > { %608 = vmatmul.mubr.bf16.gmra.mrb[44].mxu0 %v1354_v40 }
  0x7f   : > { %617 = vmatprep.mubr.bf16.mxu0 %v1383_v2 }
  0x86   : > { %618 = vmatmul.mubr.bf16.gmra.mrb[48].mxu0 %v1355_v45 }
  0x87   : > { %627 = vmatprep.mubr.bf16.mxu0 %v1383_v2 }
  0x8e   : > { %628 = vmatmul.mubr.bf16.gmra.mrb[52].mxu0 %v1356_v46 }
  0x8f   : > { %637 = vmatprep.mubr.bf16.mxu0 %v1383_v2 }
  0x96   : > { %638 = vmatmul.mubr.bf16.gmra.mrb[56].mxu0 %v1357_v47 }
  0x97   : > { %647 = vmatprep.mubr.bf16.mxu0 %v1383_v2 }
  0x9e   : > { %648 = vmatmul.mubr.bf16.gmra.mrb[60].mxu0 %v1358_v48 }
  0xf9   : > { %v499_v56 = vpop.f32.mrb[0].mxu0 }
  0xfa   : > { %v500_v57 = vadd.f32 %v499_v56, %v1561_v54  ;;  %v501_v58 = vpop.f32.mrb[1].mxu0 }
  0xfb   : > { %v502_v59 = vadd.f32 %v501_v58, %v1563_v55  ;;  %v503_v60 = vpop.f32.mrb[2].mxu0 }
  0xfc   : > { %v504_v61 = vadd.f32 %v503_v60, %v1561_v54  ;;  %v505_v62 = vpop.f32.mrb[3].mxu0  ;;  %v658_v0 = vmax.f32 %v500_v57, 0.0 }
  0xfd   : > { %v506_v63 = vadd.f32 %v505_v62, %v1563_v55  ;;  %v659_v2 = vmax.f32 %v502_v59, 0.0 }
  0xfe   : > { %v660_v1 = vmax.f32 %v504_v61, 0.0 }
  0xff   : > { %v661_v3 = vmax.f32 %v506_v63, 0.0 }
 0x100   : > { %v722_v4 = vpack.c.bf16 %v660_v1, %v658_v0 }
 0x101   : > { %v509_v5 = vpop.f32.mrb[4].mxu0  ;;  %v723_v6 = vpack.c.bf16 %v661_v3, %v659_v2 }
 0x102   : > { %v510_v7 = vadd.f32 %v509_v5, %v1561_v54  ;;  %v511_v8 = vpop.f32.mrb[5].mxu0 }
 0x103   : > { %v512_v9 = vadd.f32 %v511_v8, %v1563_v55  ;;  %v513_v10 = vpop.f32.mrb[6].mxu0  ;;  %921 = vmatprep.mubr.bf16.mxu1 %v723_v6 }
 0x104   : > { %v514_v11 = vadd.f32 %v513_v10, %v1561_v54  ;;  %v515_v12 = vpop.f32.mrb[7].mxu0  ;;  %922 = vmatmul.mubr.bf16.vlgmr.msra.gmra.mrb[0].mxu1 %v722_v4  ;;  %v662_v14 = vmax.f32 %v510_v7, 0.0 }
 0x105   : > { %v516_v13 = vadd.f32 %v515_v12, %v1563_v55  ;;  %v663_v16 = vmax.f32 %v512_v9, 0.0 }
 0x106   : > { %v664_v15 = vmax.f32 %v514_v11, 0.0 }
 0x107   : > { %v665_v17 = vmax.f32 %v516_v13, 0.0 }
 0x108   : > { %v724_v18 = vpack.c.bf16 %v664_v15, %v662_v14 }
 0x109   : > { %v725_v19 = vpack.c.bf16 %v665_v17, %v663_v16  ;;  %v519_v20 = vpop.f32.mrb[8].mxu0 }
 0x10a   : > { %v520_v21 = vadd.f32 %v519_v20, %v1561_v54  ;;  %v521_v22 = vpop.f32.mrb[9].mxu0 }
 0x10b   : > { %v522_v23 = vadd.f32 %v521_v22, %v1563_v55  ;;  %v523_v24 = vpop.f32.mrb[10].mxu0  ;;  %929 = vmatprep.mubr.bf16.mxu1 %v725_v19 }
 0x10c   : > { %v524_v25 = vadd.f32 %v523_v24, %v1561_v54  ;;  %v525_v26 = vpop.f32.mrb[11].mxu0  ;;  %930 = vmatmul.mubr.bf16.gmra.mrb[4].mxu1 %v724_v18  ;;  %v666_v28 = vmax.f32 %v520_v21, 0.0 }
 0x10d   : > { %v526_v27 = vadd.f32 %v525_v26, %v1563_v55  ;;  %v667_v30 = vmax.f32 %v522_v23, 0.0 }
 0x10e   : > { %v668_v29 = vmax.f32 %v524_v25, 0.0 }
 0x10f   : > { %v669_v31 = vmax.f32 %v526_v27, 0.0 }
 0x110   : > { %v726_v32 = vpack.c.bf16 %v668_v29, %v666_v28 }
 0x111   : > { %v727_v33 = vpack.c.bf16 %v669_v31, %v667_v30  ;;  %v529_v34 = vpop.f32.mrb[12].mxu0 }
 0x112   : > { %v530_v35 = vadd.f32 %v529_v34, %v1561_v54  ;;  %v531_v36 = vpop.f32.mrb[13].mxu0 }
 0x113   : > { %v532_v37 = vadd.f32 %v531_v36, %v1563_v55  ;;  %v533_v38 = vpop.f32.mrb[14].mxu0  ;;  %937 = vmatprep.mubr.bf16.mxu1 %v727_v33 }
 0x114   : > { %v534_v39 = vadd.f32 %v533_v38, %v1561_v54  ;;  %v535_v40 = vpop.f32.mrb[15].mxu0  ;;  %938 = vmatmul.mubr.bf16.gmra.mrb[8].mxu1 %v726_v32  ;;  %v670_v42 = vmax.f32 %v530_v35, 0.0 }
 0x115   : > { %v536_v41 = vadd.f32 %v535_v40, %v1563_v55  ;;  %v671_v44 = vmax.f32 %v532_v37, 0.0 }
 0x116   : > { %v672_v43 = vmax.f32 %v534_v39, 0.0 }
 0x117   : > { %v673_v45 = vmax.f32 %v536_v41, 0.0 }
 0x118   : > { %v728_v46 = vpack.c.bf16 %v672_v43, %v670_v42 }
 0x119   : > { %v729_v47 = vpack.c.bf16 %v673_v45, %v671_v44  ;;  %v539_v48 = vpop.f32.mrb[16].mxu0 }
 0x11a   : > { %v540_v49 = vadd.f32 %v539_v48, %v1561_v54  ;;  %v541_v50 = vpop.f32.mrb[17].mxu0 }
 0x11b   : > { %v542_v51 = vadd.f32 %v541_v50, %v1563_v55  ;;  %v543_v52 = vpop.f32.mrb[18].mxu0  ;;  %945 = vmatprep.mubr.bf16.mxu1 %v729_v47 }
 0x11c   : > { %v544_v53 = vadd.f32 %v543_v52, %v1561_v54  ;;  %v545_v56 = vpop.f32.mrb[19].mxu0  ;;  %946 = vmatmul.mubr.bf16.gmra.mrb[12].mxu1 %v728_v46  ;;  %v674_v58 = vmax.f32 %v540_v49, 0.0 }
 0x11d   : > { %v546_v57 = vadd.f32 %v545_v56, %v1563_v55  ;;  %v675_v60 = vmax.f32 %v542_v51, 0.0 }
 0x11e   : > { %v676_v59 = vmax.f32 %v544_v53, 0.0 }
 0x11f   : > { %v677_v61 = vmax.f32 %v546_v57, 0.0 }
 0x120   : > { %v730_v62 = vpack.c.bf16 %v676_v59, %v674_v58 }
 0x121   : > { %v731_v63 = vpack.c.bf16 %v677_v61, %v675_v60  ;;  %v549_v0 = vpop.f32.mrb[20].mxu0 }
 0x122   : > { %v550_v1 = vadd.f32 %v549_v0, %v1561_v54  ;;  %v551_v2 = vpop.f32.mrb[21].mxu0 }
 0x123   : > { %v552_v3 = vadd.f32 %v551_v2, %v1563_v55  ;;  %v553_v4 = vpop.f32.mrb[22].mxu0  ;;  %953 = vmatprep.mubr.bf16.mxu1 %v731_v63 }
 0x124   : > { %v554_v5 = vadd.f32 %v553_v4, %v1561_v54  ;;  %v555_v6 = vpop.f32.mrb[23].mxu0  ;;  %954 = vmatmul.mubr.bf16.gmra.mrb[16].mxu1 %v730_v62  ;;  %v678_v8 = vmax.f32 %v550_v1, 0.0 }
 0x125   : > { %v556_v7 = vadd.f32 %v555_v6, %v1563_v55  ;;  %v679_v10 = vmax.f32 %v552_v3, 0.0 }
 0x126   : > { %v680_v9 = vmax.f32 %v554_v5, 0.0 }
 0x127   : > { %v681_v11 = vmax.f32 %v556_v7, 0.0 }
 0x128   : > { %v732_v12 = vpack.c.bf16 %v680_v9, %v678_v8 }
 0x129   : > { %v733_v13 = vpack.c.bf16 %v681_v11, %v679_v10  ;;  %v559_v14 = vpop.f32.mrb[24].mxu0 }
 0x12a   : > { %v560_v15 = vadd.f32 %v559_v14, %v1561_v54  ;;  %v561_v16 = vpop.f32.mrb[25].mxu0 }
 0x12b   : > { %v562_v17 = vadd.f32 %v561_v16, %v1563_v55  ;;  %v563_v18 = vpop.f32.mrb[26].mxu0  ;;  %961 = vmatprep.mubr.bf16.mxu1 %v733_v13 }
 0x12c   : > { %v564_v19 = vadd.f32 %v563_v18, %v1561_v54  ;;  %v565_v20 = vpop.f32.mrb[27].mxu0  ;;  %962 = vmatmul.mubr.bf16.gmra.mrb[20].mxu1 %v732_v12  ;;  %v682_v22 = vmax.f32 %v560_v15, 0.0 }
 0x12d   : > { %v566_v21 = vadd.f32 %v565_v20, %v1563_v55  ;;  %v683_v24 = vmax.f32 %v562_v17, 0.0 }
 0x12e   : > { %v684_v23 = vmax.f32 %v564_v19, 0.0 }
 0x12f   : > { %v685_v25 = vmax.f32 %v566_v21, 0.0 }
 0x130   : > { %v734_v26 = vpack.c.bf16 %v684_v23, %v682_v22 }
 0x131   : > { %v735_v27 = vpack.c.bf16 %v685_v25, %v683_v24  ;;  %v569_v28 = vpop.f32.mrb[28].mxu0 }
 0x132   : > { %v570_v29 = vadd.f32 %v569_v28, %v1561_v54  ;;  %v571_v30 = vpop.f32.mrb[29].mxu0 }
 0x133   : > { %v572_v31 = vadd.f32 %v571_v30, %v1563_v55  ;;  %v573_v32 = vpop.f32.mrb[30].mxu0  ;;  %969 = vmatprep.mubr.bf16.mxu1 %v735_v27 }
 0x134   : > { %v574_v33 = vadd.f32 %v573_v32, %v1561_v54  ;;  %v575_v34 = vpop.f32.mrb[31].mxu0  ;;  %970 = vmatmul.mubr.bf16.gmra.mrb[24].mxu1 %v734_v26  ;;  %v686_v36 = vmax.f32 %v570_v29, 0.0 }
 0x135   : > { %v576_v35 = vadd.f32 %v575_v34, %v1563_v55  ;;  %v687_v38 = vmax.f32 %v572_v31, 0.0 }
 0x136   : > { %v688_v37 = vmax.f32 %v574_v33, 0.0 }
 0x137   : > { %v689_v39 = vmax.f32 %v576_v35, 0.0 }
 0x138   : > { %v736_v40 = vpack.c.bf16 %v688_v37, %v686_v36 }
 0x139   : > { %v737_v41 = vpack.c.bf16 %v689_v39, %v687_v38  ;;  %v579_v42 = vpop.f32.mrb[32].mxu0 }
 0x13a   : > { %v580_v43 = vadd.f32 %v579_v42, %v1561_v54  ;;  %v581_v44 = vpop.f32.mrb[33].mxu0 }
 0x13b   : > { %v582_v45 = vadd.f32 %v581_v44, %v1563_v55  ;;  %v583_v46 = vpop.f32.mrb[34].mxu0  ;;  %977 = vmatprep.mubr.bf16.mxu1 %v737_v41 }
 0x13c   : > { %v584_v47 = vadd.f32 %v583_v46, %v1561_v54  ;;  %v585_v48 = vpop.f32.mrb[35].mxu0  ;;  %978 = vmatmul.mubr.bf16.gmra.mrb[28].mxu1 %v736_v40  ;;  %v690_v50 = vmax.f32 %v580_v43, 0.0 }
 0x13d   : > { %v586_v49 = vadd.f32 %v585_v48, %v1563_v55  ;;  %v691_v52 = vmax.f32 %v582_v45, 0.0 }
 0x13e   : > { %v692_v51 = vmax.f32 %v584_v47, 0.0 }
 0x13f   : > { %v693_v53 = vmax.f32 %v586_v49, 0.0 }
 0x140   : > { %v738_v56 = vpack.c.bf16 %v692_v51, %v690_v50 }
 0x141   : > { %v739_v57 = vpack.c.bf16 %v693_v53, %v691_v52  ;;  %v589_v58 = vpop.f32.mrb[36].mxu0 }
 0x142   : > { %v590_v59 = vadd.f32 %v589_v58, %v1561_v54  ;;  %v591_v60 = vpop.f32.mrb[37].mxu0 }
 0x143   : > { %v592_v61 = vadd.f32 %v591_v60, %v1563_v55  ;;  %v593_v62 = vpop.f32.mrb[38].mxu0  ;;  %985 = vmatprep.mubr.bf16.mxu1 %v739_v57 }
 0x144   : > { %v594_v63 = vadd.f32 %v593_v62, %v1561_v54  ;;  %v595_v0 = vpop.f32.mrb[39].mxu0  ;;  %986 = vmatmul.mubr.bf16.gmra.mrb[32].mxu1 %v738_v56  ;;  %v694_v2 = vmax.f32 %v590_v59, 0.0 }
 0x145   : > { %v596_v1 = vadd.f32 %v595_v0, %v1563_v55  ;;  %v695_v4 = vmax.f32 %v592_v61, 0.0 }
 0x146   : > { %v696_v3 = vmax.f32 %v594_v63, 0.0 }
 0x147   : > { %v697_v5 = vmax.f32 %v596_v1, 0.0 }
 0x148   : > { %v740_v6 = vpack.c.bf16 %v696_v3, %v694_v2 }
 0x149   : > { %v741_v7 = vpack.c.bf16 %v697_v5, %v695_v4  ;;  %v599_v8 = vpop.f32.mrb[40].mxu0 }
 0x14a   : > { %v600_v9 = vadd.f32 %v599_v8, %v1561_v54  ;;  %v601_v10 = vpop.f32.mrb[41].mxu0 }
 0x14b   : > { %v602_v11 = vadd.f32 %v601_v10, %v1563_v55  ;;  %v603_v12 = vpop.f32.mrb[42].mxu0  ;;  %993 = vmatprep.mubr.bf16.mxu1 %v741_v7 }
 0x14c   : > { %v604_v13 = vadd.f32 %v603_v12, %v1561_v54  ;;  %v605_v14 = vpop.f32.mrb[43].mxu0  ;;  %994 = vmatmul.mubr.bf16.gmra.mrb[36].mxu1 %v740_v6  ;;  %v698_v16 = vmax.f32 %v600_v9, 0.0 }
 0x14d   : > { %v606_v15 = vadd.f32 %v605_v14, %v1563_v55  ;;  %v699_v18 = vmax.f32 %v602_v11, 0.0 }
 0x14e   : > { %v700_v17 = vmax.f32 %v604_v13, 0.0 }
 0x14f   : > { %v701_v19 = vmax.f32 %v606_v15, 0.0 }
 0x150   : > { %v742_v20 = vpack.c.bf16 %v700_v17, %v698_v16 }
 0x151   : > { %v743_v21 = vpack.c.bf16 %v701_v19, %v699_v18  ;;  %v609_v22 = vpop.f32.mrb[44].mxu0 }
 0x152   : > { %v610_v23 = vadd.f32 %v609_v22, %v1561_v54  ;;  %v611_v24 = vpop.f32.mrb[45].mxu0 }
 0x153   : > { %v612_v25 = vadd.f32 %v611_v24, %v1563_v55  ;;  %v613_v26 = vpop.f32.mrb[46].mxu0  ;;  %1001 = vmatprep.mubr.bf16.mxu1 %v743_v21 }
 0x154   : > { %v614_v27 = vadd.f32 %v613_v26, %v1561_v54  ;;  %v615_v28 = vpop.f32.mrb[47].mxu0  ;;  %1002 = vmatmul.mubr.bf16.gmra.mrb[40].mxu1 %v742_v20  ;;  %v702_v30 = vmax.f32 %v610_v23, 0.0 }
 0x155   : > { %v616_v29 = vadd.f32 %v615_v28, %v1563_v55  ;;  %v703_v32 = vmax.f32 %v612_v25, 0.0 }
 0x156   : > { %v704_v31 = vmax.f32 %v614_v27, 0.0 }
 0x157   : > { %v705_v33 = vmax.f32 %v616_v29, 0.0 }
 0x158   : > { %v744_v34 = vpack.c.bf16 %v704_v31, %v702_v30  ;;  %v1633_v31 = vld [vmem:[%s1711_s4] ss:$0 sm:$0xff] }
 0x159   : > { %v745_v35 = vpack.c.bf16 %v705_v33, %v703_v32  ;;  %v619_v36 = vpop.f32.mrb[48].mxu0 }
 0x15a   : > { %v620_v37 = vadd.f32 %v619_v36, %v1561_v54  ;;  %v621_v38 = vpop.f32.mrb[49].mxu0 }
 0x15b   : > { %v622_v39 = vadd.f32 %v621_v38, %v1563_v55  ;;  %v623_v40 = vpop.f32.mrb[50].mxu0  ;;  %1009 = vmatprep.mubr.bf16.mxu1 %v745_v35 }
 0x15c   : > { %v624_v41 = vadd.f32 %v623_v40, %v1561_v54  ;;  %v625_v42 = vpop.f32.mrb[51].mxu0  ;;  %1010 = vmatmul.mubr.bf16.gmra.mrb[44].mxu1 %v744_v34  ;;  %v706_v44 = vmax.f32 %v620_v37, 0.0 }
 0x15d   : > { %v626_v43 = vadd.f32 %v625_v42, %v1563_v55  ;;  %v707_v46 = vmax.f32 %v622_v39, 0.0 }
 0x15e   : > { %v708_v45 = vmax.f32 %v624_v41, 0.0 }
 0x15f   : > { %v709_v47 = vmax.f32 %v626_v43, 0.0 }
 0x160   : > { %v746_v48 = vpack.c.bf16 %v708_v45, %v706_v44 }
 0x161   : > { %v747_v49 = vpack.c.bf16 %v709_v47, %v707_v46  ;;  %v629_v50 = vpop.f32.mrb[52].mxu0 }
 0x162   : > { %v630_v51 = vadd.f32 %v629_v50, %v1561_v54  ;;  %v631_v52 = vpop.f32.mrb[53].mxu0 }
 0x163   : > { %v632_v53 = vadd.f32 %v631_v52, %v1563_v55  ;;  %v633_v56 = vpop.f32.mrb[54].mxu0  ;;  %1017 = vmatprep.mubr.bf16.mxu1 %v747_v49 }
 0x164   : > { %v634_v57 = vadd.f32 %v633_v56, %v1561_v54  ;;  %v635_v58 = vpop.f32.mrb[55].mxu0  ;;  %1018 = vmatmul.mubr.bf16.gmra.mrb[48].mxu1 %v746_v48  ;;  %v710_v60 = vmax.f32 %v630_v51, 0.0 }
 0x165   : > { %v636_v59 = vadd.f32 %v635_v58, %v1563_v55  ;;  %v711_v62 = vmax.f32 %v632_v53, 0.0 }
 0x166   : > { %v712_v61 = vmax.f32 %v634_v57, 0.0 }
 0x167   : > { %v713_v63 = vmax.f32 %v636_v59, 0.0 }
 0x168   : > { %v748_v0 = vpack.c.bf16 %v712_v61, %v710_v60 }
 0x169   : > { %v749_v1 = vpack.c.bf16 %v713_v63, %v711_v62  ;;  %v639_v2 = vpop.f32.mrb[56].mxu0 }
 0x16a   : > { %v640_v3 = vadd.f32 %v639_v2, %v1561_v54  ;;  %v641_v4 = vpop.f32.mrb[57].mxu0 }
 0x16b   : > { %v642_v5 = vadd.f32 %v641_v4, %v1563_v55  ;;  %v643_v6 = vpop.f32.mrb[58].mxu0  ;;  %1025 = vmatprep.mubr.bf16.mxu1 %v749_v1 }
 0x16c   : > { %v644_v7 = vadd.f32 %v643_v6, %v1561_v54  ;;  %v645_v8 = vpop.f32.mrb[59].mxu0  ;;  %1026 = vmatmul.mubr.bf16.gmra.mrb[52].mxu1 %v748_v0  ;;  %v714_v10 = vmax.f32 %v640_v3, 0.0 }
 0x16d   : > { %v646_v9 = vadd.f32 %v645_v8, %v1563_v55  ;;  %v715_v12 = vmax.f32 %v642_v5, 0.0 }
 0x16e   : > { %v716_v11 = vmax.f32 %v644_v7, 0.0 }
 0x16f   : > { %v717_v13 = vmax.f32 %v646_v9, 0.0 }
 0x170   : > { %v750_v14 = vpack.c.bf16 %v716_v11, %v714_v10 }
 0x171   : > { %v751_v15 = vpack.c.bf16 %v717_v13, %v715_v12  ;;  %v649_v16 = vpop.f32.mrb[60].mxu0 }
 0x172   : > { %v650_v17 = vadd.f32 %v649_v16, %v1561_v54  ;;  %v651_v18 = vpop.f32.mrb[61].mxu0 }
 0x173   : > { %v652_v19 = vadd.f32 %v651_v18, %v1563_v55  ;;  %v653_v20 = vpop.f32.mrb[62].mxu0  ;;  %1033 = vmatprep.mubr.bf16.mxu1 %v751_v15 }
 0x174   : > { %v654_v21 = vadd.f32 %v653_v20, %v1561_v54  ;;  %v655_v22 = vpop.f32.mrb[63].mxu0  ;;  %1034 = vmatmul.mubr.bf16.gmra.mrb[56].mxu1 %v750_v14  ;;  %v718_v24 = vmax.f32 %v650_v17, 0.0 }
 0x175   : > { %v656_v23 = vadd.f32 %v655_v22, %v1563_v55  ;;  %v719_v26 = vmax.f32 %v652_v19, 0.0 }
 0x176   : > { %v720_v25 = vmax.f32 %v654_v21, 0.0 }
 0x177   : > { %v721_v27 = vmax.f32 %v656_v23, 0.0 }
 0x178   : > { %v752_v28 = vpack.c.bf16 %v720_v25, %v718_v24 }
 0x179   : > { %v753_v29 = vpack.c.bf16 %v721_v27, %v719_v26 }
 0x17b   : > { %1041 = vmatprep.mubr.bf16.mxu1 %v753_v29 }
 0x17c   : > { %1042 = vmatmul.mubr.bf16.gmra.mrb[60].mxu1 %v752_v28 }
 0x1d7   : > { %v1214_v30 = vpop.f32.mrb[0].mxu1 }
 0x1d8   : > { %v1215_v54 = vpop.f32.mrb[1].mxu1 }
 0x1d9   : > { %v1216_v32 = vadd.f32 %v1215_v54, %v1214_v30  ;;  %v1217_v33 = vpop.f32.mrb[2].mxu1 }
 0x1da   : > { %v1218_v55 = vpop.f32.mrb[3].mxu1 }
 0x1db   : > { %v924_v34 = vadd.f32 %v1216_v32, %v1633_v31  ;;  %v1219_v35 = vadd.f32 %v1218_v55, %v1217_v33 }
 0x1dd   : > { %1050 = vst [vmem:[%s1638_s28] sm:$0xff] %v924_v34  ;;  %v927_v36 = vadd.f32 %v1219_v35, %v1633_v31 }
 0x1df   : > { %1051 = vst [vmem:[%s1638_s28 + $0x8] sm:$0xff] %v927_v36  ;;  %v1220_v37 = vpop.f32.mrb[4].mxu1 }
 0x1e0   : > { %v1221_v38 = vpop.f32.mrb[5].mxu1 }
 0x1e1   : > { %v1222_v39 = vadd.f32 %v1221_v38, %v1220_v37  ;;  %v1223_v40 = vpop.f32.mrb[6].mxu1 }
 0x1e2   : > { %v1224_v41 = vpop.f32.mrb[7].mxu1 }
 0x1e3   : > { %v932_v42 = vadd.f32 %v1222_v39, %v1633_v31  ;;  %v1225_v43 = vadd.f32 %v1224_v41, %v1223_v40 }
 0x1e5   : > { %1052 = vst [vmem:[%s1638_s28 + $0x10] sm:$0xff] %v932_v42  ;;  %v935_v44 = vadd.f32 %v1225_v43, %v1633_v31 }
 0x1e7   : > { %1053 = vst [vmem:[%s1638_s28 + $0x18] sm:$0xff] %v935_v44  ;;  %v1226_v45 = vpop.f32.mrb[8].mxu1 }
 0x1e8   : > { %v1227_v46 = vpop.f32.mrb[9].mxu1 }
 0x1e9   : > { %v1228_v47 = vadd.f32 %v1227_v46, %v1226_v45  ;;  %v1229_v48 = vpop.f32.mrb[10].mxu1 }
 0x1ea   : > { %v1230_v49 = vpop.f32.mrb[11].mxu1 }
 0x1eb   : > { %v940_v50 = vadd.f32 %v1228_v47, %v1633_v31  ;;  %v1231_v51 = vadd.f32 %v1230_v49, %v1229_v48 }
 0x1ed   : > { %1054 = vst [vmem:[%s1638_s28 + $0x20] sm:$0xff] %v940_v50  ;;  %v943_v52 = vadd.f32 %v1231_v51, %v1633_v31 }
 0x1ef   : > { %1055 = vst [vmem:[%s1638_s28 + $0x28] sm:$0xff] %v943_v52  ;;  %v1232_v53 = vpop.f32.mrb[12].mxu1 }
 0x1f0   : > { %v1233_v56 = vpop.f32.mrb[13].mxu1 }
 0x1f1   : > { %v1234_v57 = vadd.f32 %v1233_v56, %v1232_v53  ;;  %v1235_v58 = vpop.f32.mrb[14].mxu1 }
 0x1f2   : > { %v1236_v59 = vpop.f32.mrb[15].mxu1 }
 0x1f3   : > { %v948_v60 = vadd.f32 %v1234_v57, %v1633_v31  ;;  %v1237_v61 = vadd.f32 %v1236_v59, %v1235_v58 }
 0x1f5   : > { %1056 = vst [vmem:[%s1638_s28 + $0x30] sm:$0xff] %v948_v60  ;;  %v951_v62 = vadd.f32 %v1237_v61, %v1633_v31 }
 0x1f7   : > { %1057 = vst [vmem:[%s1638_s28 + $0x38] sm:$0xff] %v951_v62  ;;  %v1238_v63 = vpop.f32.mrb[16].mxu1 }
 0x1f8   : > { %v1239_v0 = vpop.f32.mrb[17].mxu1 }
 0x1f9   : > { %v1240_v1 = vadd.f32 %v1239_v0, %v1238_v63  ;;  %v1241_v2 = vpop.f32.mrb[18].mxu1 }
 0x1fa   : > { %v1242_v3 = vpop.f32.mrb[19].mxu1 }
 0x1fb   : > { %v956_v4 = vadd.f32 %v1240_v1, %v1633_v31  ;;  %v1243_v5 = vadd.f32 %v1242_v3, %v1241_v2 }
 0x1fd   : > { %1058 = vst [vmem:[%s1638_s28 + $0x40] sm:$0xff] %v956_v4  ;;  %v959_v6 = vadd.f32 %v1243_v5, %v1633_v31 }
 0x1ff   : > { %1059 = vst [vmem:[%s1638_s28 + $0x48] sm:$0xff] %v959_v6  ;;  %v1244_v7 = vpop.f32.mrb[20].mxu1 }
 0x200   : > { %v1245_v8 = vpop.f32.mrb[21].mxu1 }
 0x201   : > { %v1246_v9 = vadd.f32 %v1245_v8, %v1244_v7  ;;  %v1247_v10 = vpop.f32.mrb[22].mxu1 }
 0x202   : > { %v1248_v11 = vpop.f32.mrb[23].mxu1 }
 0x203   : > { %v964_v12 = vadd.f32 %v1246_v9, %v1633_v31  ;;  %v1249_v13 = vadd.f32 %v1248_v11, %v1247_v10 }
 0x205   : > { %1060 = vst [vmem:[%s1638_s28 + $0x50] sm:$0xff] %v964_v12  ;;  %v967_v14 = vadd.f32 %v1249_v13, %v1633_v31 }
 0x207   : > { %1061 = vst [vmem:[%s1638_s28 + $0x58] sm:$0xff] %v967_v14  ;;  %v1250_v15 = vpop.f32.mrb[24].mxu1 }
 0x208   : > { %v1251_v16 = vpop.f32.mrb[25].mxu1 }
 0x209   : > { %v1252_v17 = vadd.f32 %v1251_v16, %v1250_v15  ;;  %v1253_v18 = vpop.f32.mrb[26].mxu1 }
 0x20a   : > { %v1254_v19 = vpop.f32.mrb[27].mxu1 }
 0x20b   : > { %v972_v20 = vadd.f32 %v1252_v17, %v1633_v31  ;;  %v1255_v21 = vadd.f32 %v1254_v19, %v1253_v18 }
 0x20d   : > { %1062 = vst [vmem:[%s1638_s28 + $0x60] sm:$0xff] %v972_v20  ;;  %v975_v22 = vadd.f32 %v1255_v21, %v1633_v31 }
 0x20f   : > { %1063 = vst [vmem:[%s1638_s28 + $0x68] sm:$0xff] %v975_v22  ;;  %v1256_v23 = vpop.f32.mrb[28].mxu1 }
 0x210   : > { %v1257_v24 = vpop.f32.mrb[29].mxu1 }
 0x211   : > { %v1258_v25 = vadd.f32 %v1257_v24, %v1256_v23  ;;  %v1259_v26 = vpop.f32.mrb[30].mxu1 }
 0x212   : > { %v1260_v27 = vpop.f32.mrb[31].mxu1 }
 0x213   : > { %v980_v28 = vadd.f32 %v1258_v25, %v1633_v31  ;;  %v1261_v29 = vadd.f32 %v1260_v27, %v1259_v26 }
 0x215   : > { %1064 = vst [vmem:[%s1638_s28 + $0x70] sm:$0xff] %v980_v28  ;;  %v983_v30 = vadd.f32 %v1261_v29, %v1633_v31 }
 0x217   : > { %1065 = vst [vmem:[%s1638_s28 + $0x78] sm:$0xff] %v983_v30  ;;  %v1262_v54 = vpop.f32.mrb[32].mxu1 }
 0x218   : > { %v1263_v32 = vpop.f32.mrb[33].mxu1 }
 0x219   : > { %v1264_v33 = vadd.f32 %v1263_v32, %v1262_v54  ;;  %v1265_v55 = vpop.f32.mrb[34].mxu1 }
 0x21a   : > { %v1266_v34 = vpop.f32.mrb[35].mxu1 }
 0x21b   : > { %v988_v35 = vadd.f32 %v1264_v33, %v1633_v31  ;;  %v1267_v36 = vadd.f32 %v1266_v34, %v1265_v55 }
 0x21d   : > { %1066 = vst [vmem:[%s1638_s28 + $0x80] sm:$0xff] %v988_v35  ;;  %v991_v37 = vadd.f32 %v1267_v36, %v1633_v31 }
 0x21f   : > { %1067 = vst [vmem:[%s1638_s28 + $0x88] sm:$0xff] %v991_v37  ;;  %v1268_v38 = vpop.f32.mrb[36].mxu1 }
 0x220   : > { %v1269_v39 = vpop.f32.mrb[37].mxu1 }
 0x221   : > { %v1270_v40 = vadd.f32 %v1269_v39, %v1268_v38  ;;  %v1271_v41 = vpop.f32.mrb[38].mxu1 }
 0x222   : > { %v1272_v42 = vpop.f32.mrb[39].mxu1 }
 0x223   : > { %v996_v43 = vadd.f32 %v1270_v40, %v1633_v31  ;;  %v1273_v44 = vadd.f32 %v1272_v42, %v1271_v41 }
 0x225   : > { %1068 = vst [vmem:[%s1638_s28 + $0x90] sm:$0xff] %v996_v43  ;;  %v999_v45 = vadd.f32 %v1273_v44, %v1633_v31 }
 0x227   : > { %1069 = vst [vmem:[%s1638_s28 + $0x98] sm:$0xff] %v999_v45  ;;  %v1274_v46 = vpop.f32.mrb[40].mxu1 }
 0x228   : > { %v1275_v47 = vpop.f32.mrb[41].mxu1 }
 0x229   : > { %v1276_v48 = vadd.f32 %v1275_v47, %v1274_v46  ;;  %v1277_v49 = vpop.f32.mrb[42].mxu1 }
 0x22a   : > { %v1278_v50 = vpop.f32.mrb[43].mxu1 }
 0x22b   : > { %v1004_v51 = vadd.f32 %v1276_v48, %v1633_v31  ;;  %v1279_v52 = vadd.f32 %v1278_v50, %v1277_v49 }
 0x22d   : > { %1070 = vst [vmem:[%s1638_s28 + $0xa0] sm:$0xff] %v1004_v51  ;;  %v1007_v53 = vadd.f32 %v1279_v52, %v1633_v31 }
 0x22f   : > { %1071 = vst [vmem:[%s1638_s28 + $0xa8] sm:$0xff] %v1007_v53  ;;  %v1280_v56 = vpop.f32.mrb[44].mxu1 }
 0x230   : > { %v1281_v57 = vpop.f32.mrb[45].mxu1 }
 0x231   : > { %v1282_v58 = vadd.f32 %v1281_v57, %v1280_v56  ;;  %v1283_v59 = vpop.f32.mrb[46].mxu1 }
 0x232   : > { %v1284_v60 = vpop.f32.mrb[47].mxu1 }
 0x233   : > { %v1012_v61 = vadd.f32 %v1282_v58, %v1633_v31  ;;  %v1285_v62 = vadd.f32 %v1284_v60, %v1283_v59 }
 0x235   : > { %1072 = vst [vmem:[%s1638_s28 + $0xb0] sm:$0xff] %v1012_v61  ;;  %v1015_v63 = vadd.f32 %v1285_v62, %v1633_v31 }
 0x237   : > { %1073 = vst [vmem:[%s1638_s28 + $0xb8] sm:$0xff] %v1015_v63  ;;  %v1286_v0 = vpop.f32.mrb[48].mxu1 }
 0x238   : > { %v1287_v1 = vpop.f32.mrb[49].mxu1 }
 0x239   : > { %v1288_v2 = vadd.f32 %v1287_v1, %v1286_v0  ;;  %v1289_v3 = vpop.f32.mrb[50].mxu1 }
 0x23a   : > { %v1290_v4 = vpop.f32.mrb[51].mxu1 }
 0x23b   : > { %v1020_v5 = vadd.f32 %v1288_v2, %v1633_v31  ;;  %v1291_v6 = vadd.f32 %v1290_v4, %v1289_v3 }
 0x23d   : > { %1074 = vst [vmem:[%s1638_s28 + $0xc0] sm:$0xff] %v1020_v5  ;;  %v1023_v7 = vadd.f32 %v1291_v6, %v1633_v31 }
 0x23f   : > { %1075 = vst [vmem:[%s1638_s28 + $0xc8] sm:$0xff] %v1023_v7  ;;  %v1292_v8 = vpop.f32.mrb[52].mxu1 }
 0x240   : > { %v1293_v9 = vpop.f32.mrb[53].mxu1 }
 0x241   : > { %v1294_v10 = vadd.f32 %v1293_v9, %v1292_v8  ;;  %v1295_v11 = vpop.f32.mrb[54].mxu1 }
 0x242   : > { %v1296_v12 = vpop.f32.mrb[55].mxu1 }
 0x243   : > { %v1028_v13 = vadd.f32 %v1294_v10, %v1633_v31  ;;  %v1297_v14 = vadd.f32 %v1296_v12, %v1295_v11 }
 0x245   : > { %1076 = vst [vmem:[%s1638_s28 + $0xd0] sm:$0xff] %v1028_v13  ;;  %v1031_v15 = vadd.f32 %v1297_v14, %v1633_v31 }
 0x247   : > { %1077 = vst [vmem:[%s1638_s28 + $0xd8] sm:$0xff] %v1031_v15  ;;  %v1298_v16 = vpop.f32.mrb[56].mxu1 }
 0x248   : > { %v1299_v17 = vpop.f32.mrb[57].mxu1 }
 0x249   : > { %v1300_v18 = vadd.f32 %v1299_v17, %v1298_v16  ;;  %v1301_v19 = vpop.f32.mrb[58].mxu1 }
 0x24a   : > { %v1302_v20 = vpop.f32.mrb[59].mxu1 }
 0x24b   : > { %v1036_v21 = vadd.f32 %v1300_v18, %v1633_v31  ;;  %v1303_v22 = vadd.f32 %v1302_v20, %v1301_v19 }
 0x24d   : > { %1078 = vst [vmem:[%s1638_s28 + $0xe0] sm:$0xff] %v1036_v21  ;;  %v1039_v23 = vadd.f32 %v1303_v22, %v1633_v31 }
 0x24f   : > { %1079 = vst [vmem:[%s1638_s28 + $0xe8] sm:$0xff] %v1039_v23  ;;  %v1304_v24 = vpop.f32.mrb[60].mxu1 }
 0x250   : > { %v1305_v25 = vpop.f32.mrb[61].mxu1 }
 0x251   : > { %v1306_v26 = vadd.f32 %v1305_v25, %v1304_v24  ;;  %v1307_v27 = vpop.f32.mrb[62].mxu1 }
 0x252   : > { %v1308_v28 = vpop.f32.mrb[63].mxu1 }
 0x253   : > { %v1044_v29 = vadd.f32 %v1306_v26, %v1633_v31  ;;  %v1309_v30 = vadd.f32 %v1308_v28, %v1307_v27 }
 0x255   : > { %1080 = vst [vmem:[%s1638_s28 + $0xf0] sm:$0xff] %v1044_v29  ;;  %v1047_v54 = vadd.f32 %v1309_v30, %v1633_v31 }
 0x257   : > { %1081 = vst [vmem:[%s1638_s28 + $0xf8] sm:$0xff] %v1047_v54 }
 0x258 PF: > { %s15_s18 = sadd.s32 1, %s1381_s18  }
 0x259   : > { %p12_p4 = scmp.ge.s32.totalorder %s15_s18, 4  }
 0x25b   :  { %14 = sbr.rel (!%p12_p4) target bundleno = 1 (0x1), region = 70 }

</bundles_post_ra>
